<compile_context>
chip_gen: v5e
topology: v5e:2x2
jax: 0.10.0
libtpu: 0.0.40
codegen_flags: <defaults>
</compile_context>

<pallas_src>
import jax
import jax.numpy as jnp
from jax.experimental import pallas as pl
from jax.experimental.pallas import tpu as pltpu


# ----------------------------------------------------------------------------
# Kernel: one (Cout, TL) output slab of   Y[b] = W @ X[b] + bias
#   x_ref: (1, Cin, TL)   input dtype (e.g. f32)  -- cast to bf16 in-kernel
#   w_ref: (Cout, Cin)    bf16, resident (index_map constant -> loaded once)
#   b_ref: (Cout, 1)      f32,  resident
#   o_ref: (1, Cout, TL)  input dtype
# ----------------------------------------------------------------------------
def _outconv_kernel(x_ref, w_ref, b_ref, o_ref):
  x = x_ref[0].astype(jnp.bfloat16)                       # (Cin, TL)
  acc = jnp.dot(w_ref[...], x,
                preferred_element_type=jnp.float32)       # (Cout, TL) f32
  o_ref[0] = (acc + b_ref[...]).astype(o_ref.dtype)


def _choose_hw_tile(hw, batch):
  """Lane-dense HW tile: multiple of 128 (or full extent when HW < 128)."""
  tl_max = 2048
  if hw <= 128:
    return hw                                   # full-extent block is legal
  tl = min(tl_max, (hw // 128) * 128)
  # Keep >= 2 total grid steps so v7x megacore can shard the work.
  if batch == 1 and tl >= hw:
    tl = max(128, ((hw // 2) // 128) * 128)
  return tl


# ----------------------------------------------------------------------------
# Parameter setup: reshape / cast the static conv weight & bias exactly once.
# ----------------------------------------------------------------------------
def prepare_outconv_params(w_pt, b):
  """w_pt: (Cout, Cin, 1, 1) PyTorch layout, b: (Cout,)."""
  Cout, Cin = int(w_pt.shape[0]), int(w_pt.shape[1])
  w_cb = jnp.asarray(w_pt).reshape(Cout, Cin).astype(jnp.bfloat16)  # (Cout, Cin)
  b_c1 = jnp.asarray(b).reshape(Cout, 1).astype(jnp.float32)        # (Cout, 1)
  return {"w": w_cb, "b": b_c1}


# ----------------------------------------------------------------------------
# Forward: NCHW in -> NCHW out, identical semantics to nn.Conv2d(k=1).
# ----------------------------------------------------------------------------
def out_conv_forward(x_nchw, w_cb, b_c1):
  B, Cin, H, W = x_nchw.shape
  Cout = w_cb.shape[0]
  HW = H * W

  x = x_nchw.reshape(B, Cin, HW)                # contiguous view, no copy
  TL = _choose_hw_tile(HW, B)
  grid = (B, pl.cdiv(HW, TL))

  y = pl.pallas_call(
      _outconv_kernel,
      out_shape=jax.ShapeDtypeStruct((B, Cout, HW), x_nchw.dtype),
      grid_spec=pltpu.PrefetchScalarGridSpec(
          num_scalar_prefetch=0,
          grid=grid,
          in_specs=[
              pl.BlockSpec((1, Cin, TL), lambda b, t: (b, 0, t)),   # activation
              pl.BlockSpec((Cout, Cin), lambda b, t: (0, 0)),       # weight
              pl.BlockSpec((Cout, 1), lambda b, t: (0, 0)),         # bias
          ],
          out_specs=pl.BlockSpec((1, Cout, TL), lambda b, t: (b, 0, t)),
      ),
      compiler_params=pltpu.CompilerParams(
          dimension_semantics=("parallel", "parallel"),
          vmem_limit_bytes=48 * 1024 * 1024,    # safe for v7x's 64 MiB VMEM
      ),
  )(x, w_cb, b_c1)

  return y.reshape(B, Cout, H, W)


if __name__ == "__main__":
  B, Cin, Cout, S = 2, 4, 3, 16
  key = jax.random.PRNGKey(0)
  kx, kw, kb = jax.random.split(key, 3)
  x = jax.random.normal(kx, (B, Cin, S, S), jnp.float32)
  w = jax.random.normal(kw, (Cout, Cin, 1, 1), jnp.float32) * 0.1
  b = jax.random.normal(kb, (Cout,), jnp.float32) * 0.1

  params = prepare_outconv_params(w, b)
  fwd = jax.jit(out_conv_forward)
  y = jax.block_until_ready(fwd(x, params["w"], params["b"]))

  # Reference: 1x1 conv == per-pixel channel matmul (tolerance covers the
  # in-kernel bf16 cast of activations/weights; accumulation is f32).
  ref = jnp.einsum("bchw,oc->bohw", x, w.reshape(Cout, Cin)) \
      + b[None, :, None, None]
  assert y.shape == (B, Cout, S, S), y.shape
  assert jnp.all(jnp.isfinite(y))
  assert jnp.allclose(y, ref, atol=2e-2, rtol=2e-2), float(jnp.max(jnp.abs(y - ref)))
  print("KERNEL_OK")
</pallas_src>

<mosaic_0001>
module attributes {stable_mosaic.version = 11 : i64} {
  func.func @_outconv_kernel(%arg0: i32, %arg1: i32, %arg2: memref<1x4x256xf32, #tpu.memory_space<vmem>>, %arg3: memref<3x4xbf16, #tpu.memory_space<vmem>>, %arg4: memref<3x1xf32, #tpu.memory_space<vmem>>, %arg5: memref<1x3x256xf32, #tpu.memory_space<vmem>>) attributes {dimension_semantics = [#tpu.dimension_semantics<parallel>, #tpu.dimension_semantics<parallel>], iteration_bounds = array<i64: 2, 1>, scalar_prefetch = 0 : i64, scratch_operands = 0 : i64, tpu.core_type = #tpu.core_type<tc>, window_params = [{transform_indices = @transform_0, window_bounds = array<i64: 1, 4, 256>}, {pipeline_mode = #tpu.pipeline_mode<synchronous>, transform_indices = @transform_1, window_bounds = array<i64: 3, 4>}, {pipeline_mode = #tpu.pipeline_mode<synchronous>, transform_indices = @transform_2, window_bounds = array<i64: 3, 1>}, {transform_indices = @transform_3, window_bounds = array<i64: 1, 3, 256>}]} {
    %c0 = arith.constant 0 : index
    %c0_0 = arith.constant 0 : index
    %c0_1 = arith.constant 0 : index
    %0 = vector.load %arg2[%c0, %c0_0, %c0_1] : memref<1x4x256xf32, #tpu.memory_space<vmem>>, vector<1x4x256xf32>
    %1 = vector.shape_cast %0 : vector<1x4x256xf32> to vector<4x256xf32>
    %2 = arith.truncf %1 : vector<4x256xf32> to vector<4x256xbf16>
    %c0_2 = arith.constant 0 : index
    %c0_3 = arith.constant 0 : index
    %3 = vector.load %arg3[%c0_2, %c0_3] : memref<3x4xbf16, #tpu.memory_space<vmem>>, vector<3x4xbf16>
    %cst = arith.constant dense<0.000000e+00> : vector<3x256xf32>
    %4 = tpu.matmul %3, %2, %cst {dimension_numbers = #tpu.dot_dimension_numbers<[1], [0], [0], [1], [0, 0, 1, 1], [], []>} : vector<3x4xbf16>, vector<4x256xbf16>, vector<3x256xf32> -> vector<3x256xf32>
    %c0_4 = arith.constant 0 : index
    %c0_5 = arith.constant 0 : index
    %5 = vector.load %arg4[%c0_4, %c0_5] : memref<3x1xf32, #tpu.memory_space<vmem>>, vector<3x1xf32>
    %6 = vector.broadcast %5 : vector<3x1xf32> to vector<3x256xf32>
    %7 = arith.addf %4, %6 : vector<3x256xf32>
    %c0_6 = arith.constant 0 : index
    %c0_7 = arith.constant 0 : index
    %c0_8 = arith.constant 0 : index
    %8 = vector.load %arg5[%c0_6, %c0_7, %c0_8] : memref<1x3x256xf32, #tpu.memory_space<vmem>>, vector<1x3x256xf32>
    %9 = vector.shape_cast %8 : vector<1x3x256xf32> to vector<3x256xf32>
    %10 = vector.shape_cast %7 : vector<3x256xf32> to vector<1x3x256xf32>
    tpu.vector_store %arg5[%c0_6, %c0_7, %c0_8], %10 {strides = array<i32>} : memref<1x3x256xf32, #tpu.memory_space<vmem>>, vector<1x3x256xf32>,
    return
  }
  func.func @transform_0(%arg0: i32, %arg1: i32) -> (i32, i32, i32) {
    %c0_i32 = arith.constant 0 : i32
    %c0_i32_0 = arith.constant 0 : i32
    return %arg0, %c0_i32, %arg1 : i32, i32, i32
  }
  func.func @transform_1(%arg0: i32, %arg1: i32) -> (i32, i32) {
    %c0_i32 = arith.constant 0 : i32
    %c0_i32_0 = arith.constant 0 : i32
    %c0_i32_1 = arith.constant 0 : i32
    return %c0_i32, %c0_i32_0 : i32, i32
  }
  func.func @transform_2(%arg0: i32, %arg1: i32) -> (i32, i32) {
    %c0_i32 = arith.constant 0 : i32
    %c0_i32_0 = arith.constant 0 : i32
    %c0_i32_1 = arith.constant 0 : i32
    return %c0_i32, %c0_i32_0 : i32, i32
  }
  func.func @transform_3(%arg0: i32, %arg1: i32) -> (i32, i32, i32) {
    %c0_i32 = arith.constant 0 : i32
    %c0_i32_0 = arith.constant 0 : i32
    return %arg0, %c0_i32, %arg1 : i32, i32, i32
  }
}

</mosaic_0001>

<bundles_post_ra>
// kernel: out_conv_forward.1
= control target key start
LH: loop header
LB: loop body
LE: loop exit
PB: predicated region body
PF: predicated region fallthrough
CT: control target
= control target key end

     0   :  { %s444_s12 = smov 0   ;;  %s446_s13 = smov 0   ;;  %s483_s0 = inlined_call_operand.vmem [shape: f32[2,4,256], index: 0, kind: input, shape index: {}]   ;;  %s484_s1 = inlined_call_operand.vmem [shape: bf16[3,4], index: 1, kind: input, shape index: {}]   ;;  %s485_s2 = inlined_call_operand.vmem [shape: f32[3,1], index: 2, kind: input, shape index: {}]   ;;  %s486_s3 = inlined_call_operand.vmem [shape: f32[2,3,256], index: 3, kind: output, shape index: {}]  }
   0x1   :  { %s448_s14 = smov 0  }
   0x2 LB: > { %s25_s15 = sadd.s32 1, %s417_s13  ;;  %p362_p0 = scmp.ge.s32.totalorder %s421_s14, 1  ;;  %s421_s14 = sphi %s448_s14, %s13_s14   ;;  %s417_s13 = sphi %s446_s13, %s488_s13   ;;  %s413_s12 = sphi %s444_s12, %s487_s12  }
   0x3   : > { %p27_p1 = scmp.ge.s32.totalorder %s25_s15, 2  ;;  %p158_p2 = scmp.lt.s32.totalorder %s421_s14, 3 }
   0x5   : > { %s490_s15 = smov (%p27_p1, %s25_s15), 0  ;;  %p159_p3 = pnand %p362_p0, %p158_p2 }
   0x6   : > { %p191_p4 = scmp.lt.s32.totalorder (!%p159_p3), %s413_s12, 1 }
   0x7   : > { %162 = sbr.rel (%p159_p3) target bundleno = 164 (0xa4), region = 32 }
   0xc   : > { %v423_v0 = vmov 0   ;;  %v221_v1 = vld [vmem:[%s485_s2] sm:$0x7]  ;;  %s492_s12 = smov (!%p191_p4, %s413_s12), 1  ;;  %vm231_vm0 = vcmask 1041408   ;;  %vm227_vm1 = vcmask 31744  }
   0xd   : > { %398 = vset.pattern.permute.xlu0 %v423_v0  ;;  %s371_s18 = sshll.u32 %s492_s12, 3  ;;  %v220_v9 = vld [vmem:[%s484_s1] sm:$0x3]  ;;  %vm267_vm2 = vcmask 1043456  }
   0xe   : > { %224 = vperm.xlu0 %398, %v221_v1   ;;  %s198_s21 = scalar_lea.vmem %s483_s0, %s371_s18  ;;  %s208_s26 = scalar_lea.vmem %s486_s3, %s371_s18 }
   0xf   : > { %v211_v2 = vld [vmem:[%s198_s21] sm:$0xff] }
  0x10   : > { %213 = vst [vmem:[#allocation1] ss:$2 sm:$0xff] %v211_v2 }
  0x17   : > { %v214_v3 = vld.sshfl [vmem:[#allocation1] sm:$0xff pattern:$0x75316420]  ;;  %v215_v4 = vld.sshfl [vmem:[#allocation1 + $0x8] sm:$0xff pattern:$0x75316420] }
  0x18   : > { %v218_v5 = vpack.c.bf16 %v214_v3, %v214_v3  ;;  %v219_v6 = vpack.c.bf16 %v215_v4, %v215_v4 }
  0x1a   : > { %v233_v7 = vsel %vm231_vm0, %v218_v5, 0  ;;  %v236_v8 = vsel %vm231_vm0, %v219_v6, 0 }
  0x1b   : > { %245 = vmatpush.bf16.msra.mxu0 %v233_v7  ;;  %258 = vmatpush.bf16.msra.mxu1 %v236_v8 }
  0x1e   : > { %367 = vmatmul.msk.bf16.vlgmr.msra.gmra.mxu0 %vm227_vm1, %v220_v9  ;;  %368 = vmatmul.msk.bf16.vlgmr.msra.gmra.mxu1 %vm227_vm1, %v220_v9 }
  0x80   : > { %v225_v10 = vpop.permute.xlu0 %224 }
  0x9b   : > { %v247_v11 = vpop.f32.mrf.mxu0  ;;  %v260_v12 = vpop.f32.mrf.mxu1 }
  0x9c   : > { %v261_v13 = vadd.f32 %v260_v12, %v225_v10  ;;  %v248_v14 = vadd.f32 %v247_v11, %v225_v10 }
  0x9e   : > { %v266_v15 = vrot.slane %v261_v13, 4 }
  0xa0   : > { %v268_v16 = vsel %vm267_vm2, %v248_v14, %v266_v15 }
  0xa1   : > { %270 = vst [vmem:[%s208_s26] sm:$0x77] %v268_v16 }
  0xa3   : > { %v249_v17 = vpop.f32.mrf.mxu0  ;;  %v262_v18 = vpop.f32.mrf.mxu1 }
  0xa4 PF: > { %s13_s14 = sadd.s32 1, %s421_s14   ;;  %s487_s12 = smov %s417_s13 }
  0xa5   : > { %p10_p5 = scmp.ge.s32.totalorder %s13_s14, 4   ;;  %s488_s13 = smov %s490_s15 }
  0xa7   :  { %12 = sbr.rel (!%p10_p5) target bundleno = 2 (0x2), region = 62 }

</bundles_post_ra>
